<compile_context>
chip_gen: v5e
topology: v5e:2x2
jax: 0.10.0
libtpu: 0.0.40
codegen_flags: <defaults>
</compile_context>

<pallas_src>
import jax
import jax.numpy as jnp
from jax.experimental import pallas as pl
from jax.experimental.pallas import tpu as pltpu

_LANES = 128
_SUBLANES = 8


def _fused_copy_kernel(in_ref, out_ref):
    # Single unmasked full-tile copy on the VPU (lane-dense layout).
    out_ref[...] = in_ref[...]


def data_trans(x_payload, x_sequence, x_sta):
    """Pallas-backed identity data_trans for the abstract BaseModel.

    All three tensors (same dtype) are flattened, concatenated and padded to a
    lane-dense (rows, 128) slab with rows a multiple of 8, copied by a single
    pallas_call (output aliased to input), then sliced/reshaped back.
    """
    originals = (x_payload, x_sequence, x_sta)
    flats = [t.reshape(-1) for t in originals]
    sizes = [f.shape[0] for f in flats]
    total = sum(sizes)

    tile = _LANES * _SUBLANES
    padded_total = ((total + tile - 1) // tile) * tile
    rows = padded_total // _LANES

    buf = jnp.concatenate(flats)
    if padded_total > total:
        buf = jnp.pad(buf, (0, padded_total - total))
    buf2d = buf.reshape(rows, _LANES)

    out2d = pl.pallas_call(
        _fused_copy_kernel,
        out_shape=jax.ShapeDtypeStruct((rows, _LANES), buf2d.dtype),
        # Single grid point, full-array block: nothing to pipeline at ~10 KB,
        # so no extra buffering is requested.
        in_specs=[pl.BlockSpec((rows, _LANES), lambda: (0, 0),
                               memory_space=pltpu.VMEM)],
        out_specs=pl.BlockSpec((rows, _LANES), lambda: (0, 0),
                               memory_space=pltpu.VMEM),
        input_output_aliases={0: 0},
    )(buf2d)

    flat_out = out2d.reshape(-1)
    outs = []
    offset = 0
    for size, orig in zip(sizes, originals):
        outs.append(flat_out[offset:offset + size].reshape(orig.shape))
        offset += size
    return tuple(outs)


def base_model_forward(x_payload, x_sequence, x_sta):
    """Reproduces BaseModel.forward: run data_trans, return (None, None)."""
    x_payload, x_sequence, x_sta = data_trans(x_payload, x_sequence, x_sta)
    return (None, None)


if __name__ == "__main__":
    key = jax.random.PRNGKey(0)
    k1, k2, k3 = jax.random.split(key, 3)

    # Small shapes consistent with a payload/sequence/statistics triple.
    x_payload = jax.random.normal(k1, (2, 4, 16, 16), dtype=jnp.float32)   # NCHW
    x_sequence = jax.random.normal(k2, (2, 8, 32), dtype=jnp.float32)      # (B, L, D)
    x_sta = jax.random.normal(k3, (2, 32), dtype=jnp.float32)              # (B, D)

    # Kernel path (jittable now that no host sync lives inside data_trans).
    p_t, s_t, st_t = jax.block_until_ready(
        jax.jit(data_trans)(x_payload, x_sequence, x_sta))

    assert jnp.allclose(p_t, x_payload)
    assert jnp.allclose(s_t, x_sequence)
    assert jnp.allclose(st_t, x_sta)

    # Base-class forward contract: returns exactly (None, None).
    out = base_model_forward(x_payload, x_sequence, x_sta)
    assert out == (None, None)

    print("KERNEL_OK")
</pallas_src>

<mosaic_0001>
module attributes {stable_mosaic.version = 11 : i64} {
  func.func @_fused_copy_kernel(%arg0: memref<24x128xf32, #tpu.memory_space<vmem>>, %arg1: memref<24x128xf32, #tpu.memory_space<vmem>>) attributes {dimension_semantics = [], scalar_prefetch = 0 : i64, scratch_operands = 0 : i64, tpu.core_type = #tpu.core_type<tc>} {
    %c0 = arith.constant 0 : index
    %c0_0 = arith.constant 0 : index
    %0 = vector.load %arg0[%c0, %c0_0] : memref<24x128xf32, #tpu.memory_space<vmem>>, vector<24x128xf32>
    %c0_1 = arith.constant 0 : index
    %c0_2 = arith.constant 0 : index
    %1 = vector.load %arg1[%c0_1, %c0_2] : memref<24x128xf32, #tpu.memory_space<vmem>>, vector<24x128xf32>
    tpu.vector_store %arg1[%c0_1, %c0_2], %0 {strides = array<i32>} : memref<24x128xf32, #tpu.memory_space<vmem>>, vector<24x128xf32>,
    return
  }
}

</mosaic_0001>

<bundles_post_ra>
// kernel: data_trans.1
= control target key start
LH: loop header
LB: loop body
LE: loop exit
PB: predicated region body
PF: predicated region fallthrough
CT: control target
= control target key end

     0   :  { %s46_s0 = inlined_call_operand.vmem [shape: f32[24,128], index: 0, kind: input, shape index: {}, may-alias: {0,1}]   ;;  %s47_s1 = inlined_call_operand.vmem [shape: f32[24,128], index: 1, kind: output, shape index: {}, may-alias: {0,1}]  }
   0x1   :  { %v8_v0 = vld [vmem:[%s46_s0] sm:$0xff]  ;;  %v9_v1 = vld [vmem:[%s46_s0 + $0x8] sm:$0xff]  ;;  %v10_v2 = vld [vmem:[%s46_s0 + $0x10] sm:$0xff] }
   0x2   :  { %11 = vst [vmem:[%s47_s1] sm:$0xff] %v8_v0 }
   0x3   :  { %12 = vst [vmem:[%s47_s1 + $0x8] sm:$0xff] %v9_v1 }
   0x4   :  { %13 = vst [vmem:[%s47_s1 + $0x10] sm:$0xff] %v10_v2 }

</bundles_post_ra>
